<compile_context>
chip_gen: v6e
topology: v6e:2x2x1
jax: 0.10.0
libtpu: 0.0.40
codegen_flags: <defaults>
</compile_context>

<pallas_src>
import math

import jax
import jax.numpy as jnp
from jax import lax
from jax.experimental import pallas as pl
from jax.experimental.pallas import tpu as pltpu


# ----------------------------- config (small, consistent with module) ------
B = 2        # batch
S = 8        # seq_len
D = 32       # dim   (module default is 768; kept small for the demo)
H = 4        # num_heads (module default is 12)
W = D // H   # head width
DROPOUT = 0.1  # unused at inference


# ------------------- kernel A: fused head-major Q/K/V projection -----------
def qkv_proj_kernel(x_ref, w_ref, b_ref, q_ref, k_ref, v_ref):
    # x_ref: (S, D) bf16   w_ref: (3, D, W) bf16   b_ref: (3, 1, W) f32
    # q/k/v_ref: (S, W) bf16 — head width W is the full trailing axis.
    x = x_ref[...]
    q_ref[...] = (jnp.dot(x, w_ref[0], preferred_element_type=jnp.float32)
                  + b_ref[0]).astype(q_ref.dtype)
    k_ref[...] = (jnp.dot(x, w_ref[1], preferred_element_type=jnp.float32)
                  + b_ref[1]).astype(k_ref.dtype)
    v_ref[...] = (jnp.dot(x, w_ref[2], preferred_element_type=jnp.float32)
                  + b_ref[2]).astype(v_ref.dtype)


# ------------------- kernel B: flash-style attention per (b, h) ------------
def flash_attn_kernel(q_ref, k_ref, v_ref, mbias_ref, o_ref, m_sc, l_sc, acc_sc):
    ki = pl.program_id(3)

    @pl.when(ki == 0)
    def _():
        m_sc[...] = jnp.full(m_sc.shape, -jnp.inf, dtype=m_sc.dtype)
        l_sc[...] = jnp.zeros(l_sc.shape, dtype=l_sc.dtype)
        acc_sc[...] = jnp.zeros(acc_sc.shape, dtype=acc_sc.dtype)

    # scores = q @ k^T (1/sqrt(W) already folded into the Q projection);
    # contract the trailing head-width axes — no k.T, no lane slicing.
    s = lax.dot_general(q_ref[...], k_ref[...], (((1,), (1,)), ((), ())),
                        preferred_element_type=jnp.float32)     # (bq, bkv) f32
    s = s + mbias_ref[...]                                      # (1, bkv) bcast

    # online softmax — elementwise chain kept in f32 (mandatory on v5e).
    m_prev = m_sc[...]
    m_new = jnp.maximum(m_prev, jnp.max(s, axis=-1, keepdims=True))
    alpha = jnp.exp(m_prev - m_new)
    p = jnp.exp(s - m_new)
    l_sc[...] = alpha * l_sc[...] + jnp.sum(p, axis=-1, keepdims=True)
    acc_sc[...] = alpha * acc_sc[...] + jnp.dot(
        p.astype(v_ref.dtype), v_ref[...], preferred_element_type=jnp.float32)
    m_sc[...] = m_new
    # dropout on p is identity at inference (eval mode).

    @pl.when(ki == pl.num_programs(3) - 1)
    def _():
        inv_l = pl.reciprocal(l_sc[...], approx=True)           # EUP slot
        o_ref[...] = (acc_sc[...] * inv_l).astype(o_ref.dtype)


# ------------------------------- wrapper ------------------------------------
def multi_headed_self_attention(x, mask, params, *, block_q=None, block_kv=None):
    # Demo blocks cover the full (tiny) sequence; at real sizes pick
    # block_q/block_kv in 128-512 (kv a multiple of 256 on v6e/v7x) and
    # roughly halve the VMEM budget/tiles on v7x (64 MiB physical VMEM).
    block_q = S if block_q is None else block_q
    block_kv = S if block_kv is None else block_kv
    nq, nk = S // block_q, S // block_kv

    inv_sqrt_w = 1.0 / math.sqrt(W)

    # One-time host-side prep.  nn.Linear stores weight as (out, in), so
    # y = x @ W.T; build head-major (3, H, D, W) operands with the attention
    # scale folded into Q, then cast the MXU operands to bf16 (accumulation
    # stays f32 in-kernel; bias added post-accumulation in f32).
    def w_heads_of(w):                       # (D, D) -> (H, D, W)
        return w.T.reshape(D, H, W).transpose(1, 0, 2)

    w_heads = jnp.stack([w_heads_of(params["wq"]) * inv_sqrt_w,
                         w_heads_of(params["wk"]),
                         w_heads_of(params["wv"])]).astype(jnp.bfloat16)
    b_heads = jnp.stack([params["bq"].reshape(H, 1, W) * inv_sqrt_w,
                         params["bk"].reshape(H, 1, W),
                         params["bv"].reshape(H, 1, W)]).astype(jnp.float32)

    x_bf16 = x.astype(jnp.bfloat16)
    # Additive mask bias computed once: scores += -10000 * (1 - mask).
    mbias = -10000.0 * (1.0 - mask.astype(jnp.float32))          # (B, S)

    # ---- pass 1: head-major fused QKV projection -> 3 x (B, H, S, W) bf16 --
    q, k, v = pl.pallas_call(
        qkv_proj_kernel,
        out_shape=(jax.ShapeDtypeStruct((B, H, S, W), jnp.bfloat16),
                   jax.ShapeDtypeStruct((B, H, S, W), jnp.bfloat16),
                   jax.ShapeDtypeStruct((B, H, S, W), jnp.bfloat16)),
        grid_spec=pltpu.PrefetchScalarGridSpec(
            num_scalar_prefetch=0,
            grid=(B, H),     # h fastest: x block index (b,0,0) is constant
                             # across heads, so x is fetched once per batch.
            in_specs=[
                pl.BlockSpec((pl.Squeezed(), S, D), lambda b, h: (b, 0, 0)),
                pl.BlockSpec((3, pl.Squeezed(), D, W), lambda b, h: (0, h, 0, 0)),
                pl.BlockSpec((3, pl.Squeezed(), 1, W), lambda b, h: (0, h, 0, 0)),
            ],
            out_specs=[
                pl.BlockSpec((pl.Squeezed(), pl.Squeezed(), S, W),
                             lambda b, h: (b, h, 0, 0)),
                pl.BlockSpec((pl.Squeezed(), pl.Squeezed(), S, W),
                             lambda b, h: (b, h, 0, 0)),
                pl.BlockSpec((pl.Squeezed(), pl.Squeezed(), S, W),
                             lambda b, h: (b, h, 0, 0)),
            ],
        ),
        compiler_params=pltpu.CompilerParams(
            dimension_semantics=("parallel", "parallel"),
            vmem_limit_bytes=32 * 1024 * 1024),
    )(x_bf16, w_heads, b_heads)

    # ---- pass 2: flash-style attention over (B, H, q_blocks, kv_blocks) ----
    out_bhsw = pl.pallas_call(
        flash_attn_kernel,
        out_shape=jax.ShapeDtypeStruct((B, H, S, W), jnp.bfloat16),
        grid_spec=pltpu.PrefetchScalarGridSpec(
            num_scalar_prefetch=0,
            grid=(B, H, nq, nk),               # kv (reduction) axis last
            in_specs=[
                pl.BlockSpec((pl.Squeezed(), pl.Squeezed(), block_q, W),
                             lambda b, h, qi, ki: (b, h, qi, 0)),
                pl.BlockSpec((pl.Squeezed(), pl.Squeezed(), block_kv, W),
                             lambda b, h, qi, ki: (b, h, ki, 0)),
                pl.BlockSpec((pl.Squeezed(), pl.Squeezed(), block_kv, W),
                             lambda b, h, qi, ki: (b, h, ki, 0)),
                pl.BlockSpec((1, block_kv), lambda b, h, qi, ki: (b, ki)),
            ],
            out_specs=pl.BlockSpec((pl.Squeezed(), pl.Squeezed(), block_q, W),
                                   lambda b, h, qi, ki: (b, h, qi, 0)),
            scratch_shapes=[pltpu.VMEM((block_q, 1), jnp.float32),   # m
                            pltpu.VMEM((block_q, 1), jnp.float32),   # l
                            pltpu.VMEM((block_q, W), jnp.float32)],  # acc
        ),
        compiler_params=pltpu.CompilerParams(
            dimension_semantics=("parallel", "parallel", "parallel", "arbitrary"),
            vmem_limit_bytes=32 * 1024 * 1024),
    )(q, k, v, mbias)

    # Head merge (B, H, S, W) -> (B, S, D): one wrapper-side XLA transpose
    # (kept out of the kernel so no in-kernel lane slicing is needed).
    return out_bhsw.transpose(0, 2, 1, 3).reshape(B, S, D)


# ----------------------------- reference (pure JAX, f32) --------------------
def reference(x, mask, params):
    q = x @ params["wq"].T + params["bq"]
    k = x @ params["wk"].T + params["bk"]
    v = x @ params["wv"].T + params["bv"]
    to_heads = lambda t: t.reshape(B, S, H, W).transpose(0, 2, 1, 3)
    qh, kh, vh = to_heads(q), to_heads(k), to_heads(v)
    scores = jnp.einsum("bhsw,bhtw->bhst", qh, kh) / math.sqrt(W)
    m = mask.astype(jnp.float32)[:, None, None, :]
    scores = scores - 10000.0 * (1.0 - m)
    scores = jax.nn.softmax(scores, axis=-1)
    h = jnp.einsum("bhst,bhtw->bhsw", scores, vh)
    return h.transpose(0, 2, 1, 3).reshape(B, S, D)


if __name__ == "__main__":
    key = jax.random.PRNGKey(0)
    kx, kq, kk, kv, kbq, kbk, kbv = jax.random.split(key, 7)

    x = jax.random.normal(kx, (B, S, D), dtype=jnp.float32)
    # mask: (B, S), 1 = attend, 0 = masked out (pad a couple of positions)
    mask = jnp.ones((B, S), dtype=jnp.int32).at[0, S - 2:].set(0)

    scale = 1.0 / math.sqrt(D)  # roughly matches nn.Linear init range
    params = {
        "wq": jax.random.uniform(kq, (D, D), jnp.float32, -scale, scale),
        "wk": jax.random.uniform(kk, (D, D), jnp.float32, -scale, scale),
        "wv": jax.random.uniform(kv, (D, D), jnp.float32, -scale, scale),
        "bq": jax.random.uniform(kbq, (D,), jnp.float32, -scale, scale),
        "bk": jax.random.uniform(kbk, (D,), jnp.float32, -scale, scale),
        "bv": jax.random.uniform(kbv, (D,), jnp.float32, -scale, scale),
    }

    out = multi_headed_self_attention(x, mask, params)
    out = jax.block_until_ready(out)

    ref = reference(x, mask, params)
    assert out.shape == (B, S, D)
    # Tolerance reflects bf16 MXU operands + bf16 output (and the approximate
    # EUP reciprocal) compared against a pure-f32 reference.
    assert jnp.allclose(out.astype(jnp.float32), ref, atol=5e-2, rtol=5e-2), \
        "mismatch vs reference"

    print("KERNEL_OK")
</pallas_src>

<mosaic_0001>
module attributes {stable_mosaic.version = 11 : i64} {
  func.func @qkv_proj_kernel(%arg0: i32, %arg1: i32, %arg2: memref<1x8x32xbf16, #tpu.memory_space<vmem>>, %arg3: memref<3x1x32x8xbf16, #tpu.memory_space<vmem>>, %arg4: memref<3x1x1x8xf32, #tpu.memory_space<vmem>>, %arg5: memref<1x1x8x8xbf16, #tpu.memory_space<vmem>>, %arg6: memref<1x1x8x8xbf16, #tpu.memory_space<vmem>>, %arg7: memref<1x1x8x8xbf16, #tpu.memory_space<vmem>>) attributes {dimension_semantics = [#tpu.dimension_semantics<parallel>, #tpu.dimension_semantics<parallel>], iteration_bounds = array<i64: 2, 4>, scalar_prefetch = 0 : i64, scratch_operands = 0 : i64, tpu.core_type = #tpu.core_type<tc>, window_params = [{transform_indices = @transform_0, window_bounds = array<i64: 1, 8, 32>}, {transform_indices = @transform_1, window_bounds = array<i64: 3, 1, 32, 8>}, {transform_indices = @transform_2, window_bounds = array<i64: 3, 1, 1, 8>}, {transform_indices = @transform_3, window_bounds = array<i64: 1, 1, 8, 8>}, {transform_indices = @transform_4, window_bounds = array<i64: 1, 1, 8, 8>}, {transform_indices = @transform_5, window_bounds = array<i64: 1, 1, 8, 8>}]} {
    %c0 = arith.constant 0 : index
    %c0_0 = arith.constant 0 : index
    %c0_1 = arith.constant 0 : index
    %0 = vector.load %arg2[%c0, %c0_0, %c0_1] : memref<1x8x32xbf16, #tpu.memory_space<vmem>>, vector<1x8x32xbf16>
    %1 = vector.shape_cast %0 : vector<1x8x32xbf16> to vector<8x32xbf16>
    %c0_2 = arith.constant 0 : index
    %c0_3 = arith.constant 0 : index
    %c0_4 = arith.constant 0 : index
    %c0_5 = arith.constant 0 : index
    %2 = vector.load %arg3[%c0_2, %c0_3, %c0_4, %c0_5] : memref<3x1x32x8xbf16, #tpu.memory_space<vmem>>, vector<1x1x32x8xbf16>
    %3 = vector.shape_cast %2 : vector<1x1x32x8xbf16> to vector<32x8xbf16>
    %cst = arith.constant dense<0.000000e+00> : vector<8x8xf32>
    %4 = tpu.matmul %1, %3, %cst {dimension_numbers = #tpu.dot_dimension_numbers<[1], [0], [0], [1], [0, 0, 1, 1], [], []>} : vector<8x32xbf16>, vector<32x8xbf16>, vector<8x8xf32> -> vector<8x8xf32>
    %c0_6 = arith.constant 0 : index
    %c0_7 = arith.constant 0 : index
    %c0_8 = arith.constant 0 : index
    %c0_9 = arith.constant 0 : index
    %5 = vector.load %arg4[%c0_6, %c0_7, %c0_8, %c0_9] : memref<3x1x1x8xf32, #tpu.memory_space<vmem>>, vector<1x1x1x8xf32>
    %6 = vector.shape_cast %5 : vector<1x1x1x8xf32> to vector<1x8xf32>
    %7 = vector.broadcast %6 : vector<1x8xf32> to vector<8x8xf32>
    %8 = arith.addf %4, %7 : vector<8x8xf32>
    %9 = arith.truncf %8 : vector<8x8xf32> to vector<8x8xbf16>
    %c0_10 = arith.constant 0 : index
    %c0_11 = arith.constant 0 : index
    %c0_12 = arith.constant 0 : index
    %c0_13 = arith.constant 0 : index
    %10 = vector.load %arg5[%c0_10, %c0_11, %c0_12, %c0_13] : memref<1x1x8x8xbf16, #tpu.memory_space<vmem>>, vector<1x1x8x8xbf16>
    %11 = vector.shape_cast %10 : vector<1x1x8x8xbf16> to vector<8x8xbf16>
    %12 = vector.shape_cast %9 : vector<8x8xbf16> to vector<1x1x8x8xbf16>
    tpu.vector_store %arg5[%c0_10, %c0_11, %c0_12, %c0_13], %12 {strides = array<i32>} : memref<1x1x8x8xbf16, #tpu.memory_space<vmem>>, vector<1x1x8x8xbf16>,
    %c1 = arith.constant 1 : index
    %c0_14 = arith.constant 0 : index
    %c0_15 = arith.constant 0 : index
    %c0_16 = arith.constant 0 : index
    %13 = vector.load %arg3[%c1, %c0_14, %c0_15, %c0_16] : memref<3x1x32x8xbf16, #tpu.memory_space<vmem>>, vector<1x1x32x8xbf16>
    %14 = vector.shape_cast %13 : vector<1x1x32x8xbf16> to vector<32x8xbf16>
    %cst_17 = arith.constant dense<0.000000e+00> : vector<8x8xf32>
    %15 = tpu.matmul %1, %14, %cst_17 {dimension_numbers = #tpu.dot_dimension_numbers<[1], [0], [0], [1], [0, 0, 1, 1], [], []>} : vector<8x32xbf16>, vector<32x8xbf16>, vector<8x8xf32> -> vector<8x8xf32>
    %c1_18 = arith.constant 1 : index
    %c0_19 = arith.constant 0 : index
    %c0_20 = arith.constant 0 : index
    %c0_21 = arith.constant 0 : index
    %16 = vector.load %arg4[%c1_18, %c0_19, %c0_20, %c0_21] : memref<3x1x1x8xf32, #tpu.memory_space<vmem>>, vector<1x1x1x8xf32>
    %17 = vector.shape_cast %16 : vector<1x1x1x8xf32> to vector<1x8xf32>
    %18 = vector.broadcast %17 : vector<1x8xf32> to vector<8x8xf32>
    %19 = arith.addf %15, %18 : vector<8x8xf32>
    %20 = arith.truncf %19 : vector<8x8xf32> to vector<8x8xbf16>
    %c0_22 = arith.constant 0 : index
    %c0_23 = arith.constant 0 : index
    %c0_24 = arith.constant 0 : index
    %c0_25 = arith.constant 0 : index
    %21 = vector.load %arg6[%c0_22, %c0_23, %c0_24, %c0_25] : memref<1x1x8x8xbf16, #tpu.memory_space<vmem>>, vector<1x1x8x8xbf16>
    %22 = vector.shape_cast %21 : vector<1x1x8x8xbf16> to vector<8x8xbf16>
    %23 = vector.shape_cast %20 : vector<8x8xbf16> to vector<1x1x8x8xbf16>
    tpu.vector_store %arg6[%c0_22, %c0_23, %c0_24, %c0_25], %23 {strides = array<i32>} : memref<1x1x8x8xbf16, #tpu.memory_space<vmem>>, vector<1x1x8x8xbf16>,
    %c2 = arith.constant 2 : index
    %c0_26 = arith.constant 0 : index
    %c0_27 = arith.constant 0 : index
    %c0_28 = arith.constant 0 : index
    %24 = vector.load %arg3[%c2, %c0_26, %c0_27, %c0_28] : memref<3x1x32x8xbf16, #tpu.memory_space<vmem>>, vector<1x1x32x8xbf16>
    %25 = vector.shape_cast %24 : vector<1x1x32x8xbf16> to vector<32x8xbf16>
    %cst_29 = arith.constant dense<0.000000e+00> : vector<8x8xf32>
    %26 = tpu.matmul %1, %25, %cst_29 {dimension_numbers = #tpu.dot_dimension_numbers<[1], [0], [0], [1], [0, 0, 1, 1], [], []>} : vector<8x32xbf16>, vector<32x8xbf16>, vector<8x8xf32> -> vector<8x8xf32>
    %c2_30 = arith.constant 2 : index
    %c0_31 = arith.constant 0 : index
    %c0_32 = arith.constant 0 : index
    %c0_33 = arith.constant 0 : index
    %27 = vector.load %arg4[%c2_30, %c0_31, %c0_32, %c0_33] : memref<3x1x1x8xf32, #tpu.memory_space<vmem>>, vector<1x1x1x8xf32>
    %28 = vector.shape_cast %27 : vector<1x1x1x8xf32> to vector<1x8xf32>
    %29 = vector.broadcast %28 : vector<1x8xf32> to vector<8x8xf32>
    %30 = arith.addf %26, %29 : vector<8x8xf32>
    %31 = arith.truncf %30 : vector<8x8xf32> to vector<8x8xbf16>
    %c0_34 = arith.constant 0 : index
    %c0_35 = arith.constant 0 : index
    %c0_36 = arith.constant 0 : index
    %c0_37 = arith.constant 0 : index
    %32 = vector.load %arg7[%c0_34, %c0_35, %c0_36, %c0_37] : memref<1x1x8x8xbf16, #tpu.memory_space<vmem>>, vector<1x1x8x8xbf16>
    %33 = vector.shape_cast %32 : vector<1x1x8x8xbf16> to vector<8x8xbf16>
    %34 = vector.shape_cast %31 : vector<8x8xbf16> to vector<1x1x8x8xbf16>
    tpu.vector_store %arg7[%c0_34, %c0_35, %c0_36, %c0_37], %34 {strides = array<i32>} : memref<1x1x8x8xbf16, #tpu.memory_space<vmem>>, vector<1x1x8x8xbf16>,
    return
  }
  func.func @transform_0(%arg0: i32, %arg1: i32) -> (i32, i32, i32) {
    %c0_i32 = arith.constant 0 : i32
    %c0_i32_0 = arith.constant 0 : i32
    %c0_i32_1 = arith.constant 0 : i32
    return %arg0, %c0_i32, %c0_i32_0 : i32, i32, i32
  }
  func.func @transform_1(%arg0: i32, %arg1: i32) -> (i32, i32, i32, i32) {
    %c0_i32 = arith.constant 0 : i32
    %c0_i32_0 = arith.constant 0 : i32
    %c0_i32_1 = arith.constant 0 : i32
    %c0_i32_2 = arith.constant 0 : i32
    return %c0_i32, %arg1, %c0_i32_0, %c0_i32_1 : i32, i32, i32, i32
  }
  func.func @transform_2(%arg0: i32, %arg1: i32) -> (i32, i32, i32, i32) {
    %c0_i32 = arith.constant 0 : i32
    %c0_i32_0 = arith.constant 0 : i32
    %c0_i32_1 = arith.constant 0 : i32
    %c0_i32_2 = arith.constant 0 : i32
    return %c0_i32, %arg1, %c0_i32_0, %c0_i32_1 : i32, i32, i32, i32
  }
  func.func @transform_3(%arg0: i32, %arg1: i32) -> (i32, i32, i32, i32) {
    %c0_i32 = arith.constant 0 : i32
    %c0_i32_0 = arith.constant 0 : i32
    %c0_i32_1 = arith.constant 0 : i32
    return %arg0, %arg1, %c0_i32, %c0_i32_0 : i32, i32, i32, i32
  }
  func.func @transform_4(%arg0: i32, %arg1: i32) -> (i32, i32, i32, i32) {
    %c0_i32 = arith.constant 0 : i32
    %c0_i32_0 = arith.constant 0 : i32
    %c0_i32_1 = arith.constant 0 : i32
    return %arg0, %arg1, %c0_i32, %c0_i32_0 : i32, i32, i32, i32
  }
  func.func @transform_5(%arg0: i32, %arg1: i32) -> (i32, i32, i32, i32) {
    %c0_i32 = arith.constant 0 : i32
    %c0_i32_0 = arith.constant 0 : i32
    %c0_i32_1 = arith.constant 0 : i32
    return %arg0, %arg1, %c0_i32, %c0_i32_0 : i32, i32, i32, i32
  }
}

</mosaic_0001>

<bundles_post_ra>
// kernel: tpu_custom_call.1
= control target key start
LH: loop header
LB: loop body
LE: loop exit
PB: predicated region body
PF: predicated region fallthrough
CT: control target
= control target key end

     0   :  { %s1512_s0 = inlined_call_operand.vmem [shape: bf16[2,8,32], index: 0, kind: input, shape index: {}]   ;;  %s1513_s1 = inlined_call_operand.vmem [shape: bf16[3,4,32,8], index: 1, kind: input, shape index: {}]   ;;  %s1514_s2 = inlined_call_operand.vmem [shape: f32[3,4,1,8], index: 2, kind: input, shape index: {}]   ;;  %s1515_s3 = inlined_call_operand.hbm [shape: bf16[2,4,8,8], index: 3, kind: output, shape index: {0}]   ;;  %s1516_s4 = inlined_call_operand.hbm [shape: bf16[2,4,8,8], index: 4, kind: output, shape index: {1}]   ;;  %s1517_s5 = inlined_call_operand.hbm [shape: bf16[2,4,8,8], index: 5, kind: output, shape index: {2}]  }
   0x1   :  { %1523 = sst [smem:[#allocation13_spill]] %s1512_s0 }
   0x2   :  { %1524 = sst [smem:[#allocation14_spill]] %s1513_s1 }
   0x3   :  { %1525 = sst [smem:[#allocation15_spill]] %s1514_s2 }
   0x4   :  { %11 = vsyncpa [#allocation5], 0 }
   0x5   :  { %13 = vsyncpa [#allocation5 + $0x1], 0 }
   0x6   :  { %14 = vsyncpa [#allocation7], 0 }
   0x7   :  { %16 = vsyncpa [#allocation7 + $0x1], 0  ;;  %s1248_s18 = smov 0   ;;  %s1250_s19 = smov 0  }
   0x8   :  { %s1252_s20 = smov 0   ;;  %s1254_s21 = smov 0  }
   0x9   :  { %s1256_s22 = smov 0   ;;  %s1258_s23 = smov 0  }
   0xa   :  { %s1260_s24 = smov 0   ;;  %s1262_s25 = smov 0  }
   0xb   :  { %s1264_s26 = smov 0   ;;  %s1266_s27 = smov 0  }
   0xc LB: > { %s1519_s28 = sadd.s32 4294967295, %s1211_s27   ;;  %s1518_s29 = sadd.s32 4294967294, %s1211_s27   ;;  %s1211_s27 = sphi %s1266_s27, %s22_s27   ;;  %s1207_s26 = sphi %s1264_s26, %s1547_s26   ;;  %s1203_s25 = sphi %s1262_s25, %s1546_s25   ;;  %s1199_s24 = sphi %s1260_s24, %s1545_s24   ;;  %s1195_s23 = sphi %s1258_s23, %s1544_s23   ;;  %s1191_s22 = sphi %s1256_s22, %s1543_s22   ;;  %s1187_s21 = sphi %s1254_s21, %s1542_s21   ;;  %s1183_s20 = sphi %s1252_s20, %s1541_s20   ;;  %s1179_s19 = sphi %s1250_s19, %s1540_s19   ;;  %s1175_s18 = sphi %s1248_s18, %s1539_s18  }
   0xd   : > { %s31_s30 = sadd.s32 1, %s1203_s25  ;;  %s34_s6 = sadd.s32 1, %s1207_s26 }
   0xe   : > { %p32_p0 = scmp.ge.s32.totalorder %s31_s30, 4  ;;  %s67_s7 = sadd.s32 1, %s1191_s22 }
   0xf   : > { %p74_p1 = scmp.ne.s32.totalorder %s1191_s22, %s1187_s21  ;;  %p75_p2 = scmp.eq.s32.totalorder %s1211_s27, 0 }
  0x10   : > { %s1549_s30 = smov (%p32_p0, %s31_s30), 0  ;;  %s1551_s6 = smov (!%p32_p0, %s34_s6), %s1207_s26 }
  0x11   : > { %1526 = sst [smem:[#allocation11_spill]] %s1549_s30  ;;  %s64_s8 = ssub.s32 %s1203_s25, %s1549_s30 }
  0x12   : > { %p1311_p3 = por %p75_p2, %p74_p1  ;;  %p36_p4 = scmp.ge.s32.totalorder %s1551_s6, 2 }
  0x13   : > { %p65_p5 = scmp.eq.s32.totalorder %s64_s8, 0  ;;  %s121_s10 = sadd.s32 1, %s1183_s20 }
  0x14   : > { %p131_p6 = scmp.ne.s32.totalorder %s1183_s20, %s1179_s19  ;;  %s1553_s6 = smov (%p36_p4, %s1551_s6), 0 }
  0x15   : > { %1528 = sst [smem:[#allocation12_spill]] %s1553_s6  ;;  %s116_s12 = ssub.s32 %s1207_s26, %s1553_s6 }
  0x16   : > { %s1321_s11 = scalar_select %p65_p5, %s1191_s22, %s67_s7  }
  0x17   : > { %p132_p7 = scmp.eq.s32.totalorder %s1519_s28, 7  ;;  %s118_s13 = sor.u32 %s116_s12, %s64_s8 }
  0x18   : > { %p137_p8 = scmp.ne.s32.totalorder %s1179_s19, %s1175_s18  ;;  %p119_p9 = scmp.eq.s32.totalorder %s118_s13, 0 }
  0x19   : > { %p1329_p10 = por %p132_p7, %p131_p6  ;;  %p138_p11 = scmp.eq.s32.totalorder %s1518_s29, 7 }
  0x1a   : > { %s1336_s15 = scalar_select %p119_p9, %s1183_s20, %s121_s10  }
  0x1b   : > { %p1338_p12 = por %p138_p11, %p137_p8  ;;  %p863_p13 = scmp.ge.s32.totalorder %s1211_s27, 8 }
  0x1d   : > { %210 = sbr.rel (%p863_p13) target bundleno = 58 (0x3a), region = 16 }
  0x22   : > { %220 = sbr.rel (!%p1311_p3) target bundleno = 47 (0x2f), region = 24  ;;  %s222_s17 = sand.u32 (%p1311_p3), 1, %s1191_s22  }
  0x23   : > { %s904_s7 = sshll.u32 (%p1311_p3), %s1203_s25, 4  ;;  %s938_s8 = smul.u32 (%p1311_p3), 48, %s222_s17 }
  0x24   : > { %s1531_s1 = sld [smem:[#allocation14_spill]] (%p1311_p3) }
  0x25   : > { %s224_s29 = scalar_lea.vmem (%p1311_p3), [#allocation2], %s938_s8 }
  0x2a   : > { %s227_s10 = scalar_lea.vmem %s1531_s1, %s904_s7 }
  0x2b   : > { %v244_v0 = vld [vmem:[%s227_s10] sm:$0xff]   ;;  %v248_v1 = vld [vmem:[%s227_s10 + $0x8] sm:$0xff]  }
  0x2c   : > { %v252_v2 = vld [vmem:[%s227_s10 + $0x40] sm:$0xff]   ;;  %v256_v3 = vld [vmem:[%s227_s10 + $0x48] sm:$0xff]   ;;  %245 = vst [vmem:[%s224_s29] sm:$0xff] %v244_v0   ;;  %249 = vst [vmem:[%s224_s29 + $0x8] sm:$0xff] %v248_v1  }
  0x2d   : > { %v260_v4 = vld [vmem:[%s227_s10 + $0x80] sm:$0xff]   ;;  %v264_v5 = vld [vmem:[%s227_s10 + $0x88] sm:$0xff]   ;;  %253 = vst [vmem:[%s224_s29 + $0x10] sm:$0xff] %v252_v2   ;;  %257 = vst [vmem:[%s224_s29 + $0x18] sm:$0xff] %v256_v3  }
  0x2e   : > { %261 = vst [vmem:[%s224_s29 + $0x20] sm:$0xff] %v260_v4   ;;  %265 = vst [vmem:[%s224_s29 + $0x28] sm:$0xff] %v264_v5  }
  0x2f PF: > { %315 = sbr.rel (!%p1311_p3) target bundleno = 58 (0x3a), region = 65  ;;  %s317_s17 = sand.u32 (%p1311_p3), 1, %s1191_s22  }
  0x30   : > { %s1532_s2 = sld [smem:[#allocation15_spill]] (%p1311_p3)  ;;  %s939_s28 = smul.u32 (%p1311_p3), 3, %s317_s17 }
  0x32   : > { %s319_s8 = scalar_lea.vmem (%p1311_p3), [#allocation3], %s939_s28 }
  0x36   : > { %s320_s13 = scalar_lea.vmem %s1532_s2, %s1203_s25 }
  0x37   : > { %v337_v6 = vld [vmem:[%s320_s13] sm:$0x1]  ;;  %v339_v7 = vld [vmem:[%s320_s13 + $0x4] sm:$0x1]  ;;  %v341_v8 = vld [vmem:[%s320_s13 + $0x8] sm:$0x1] }
  0x38   : > { %338 = vst [vmem:[%s319_s8] sm:$0x1] %v337_v6  ;;  %340 = vst [vmem:[%s319_s8 + $0x1] sm:$0x1] %v339_v7 }
  0x39   : > { %342 = vst [vmem:[%s319_s8 + $0x2] sm:$0x1] %v341_v8 }
  0x3a PF: > { %p866_p0 = scmp.ge.s32.totalorder %s1211_s27, 1  ;;  %p363_p1 = scmp.lt.s32.totalorder %s1211_s27, 9 }
  0x3c   : > { %p364_p2 = pnand %p866_p0, %p363_p1 }
  0x3d   : > { %s370_s29 = sand.u32 (!%p364_p2), 1, %s1187_s21   ;;  %p422_p3 = scmp.lt.s32.totalorder (!%p364_p2), %s1199_s24, 1 }
  0x3e   : > { %367 = sbr.rel (%p364_p2) target bundleno = 333 (0x14d), region = 99  ;;  %s1533_s0 = sld [smem:[#allocation13_spill]] (!%p364_p2) }
  0x3f   : > { %s940_s28 = smul.u32 (!%p364_p2), 48, %s370_s29 }
  0x40   : > { %s941_s8 = smul.u32 (!%p364_p2), 3, %s370_s29 }
  0x41   : > { %s372_s10 = scalar_lea.vmem (!%p364_p2), [#allocation2], %s940_s28  ;;  %s1520_s28 = sand.u32 (!%p364_p2), 1, %s1179_s19  }
  0x42   : > { %s379_s12 = scalar_lea.vmem (!%p364_p2), [#allocation3], %s941_s8 }
  0x43   : > { %v1213_v9 = vmov 0.0   ;;  %vm1214_vm0 = vmmov 0   ;;  %s423_s9 = scalar_select %p422_p3, %s1199_s24, 1  ;;  %v1041_v10 = vld [vmem:[%s372_s10 + $0x8] sm:$0xff]   ;;  %v1042_v11 = vld [vmem:[%s372_s10 + $0x18] sm:$0xff]   ;;  %v1043_v12 = vld [vmem:[%s372_s10] sm:$0xff]  }
  0x44   : > { %914 = vmatprep.subr.bf16.mxu0 %v1213_v9  ;;  %922 = vmatprep.subr.bf16.mxu1 %v1213_v9  ;;  %v1044_v13 = vld [vmem:[%s372_s10 + $0x10] sm:$0xff]   ;;  %vm451_vm1 = vcmask 261120   ;;  %v1045_v15 = vld [vmem:[%s372_s10 + $0x28] sm:$0xff]   ;;  %v1046_v16 = vld [vmem:[%s372_s10 + $0x20] sm:$0xff]   ;;  %vm496_vm2 = vcmask 60416  }
  0x45   : > { %918 = vmatprep.mubr.msk.bf16.mxu0 %vm1214_vm0, %v1213_v9  ;;  %926 = vmatprep.mubr.msk.bf16.mxu1 %vm1214_vm0, %v1213_v9  ;;  %s870_s17 = sshll.u32 %s423_s9, 2  ;;  %s896_s9 = sshll.u32 %s1199_s24, 2  ;;  %v871_v17 = vld [vmem:[%s379_s12] ss:$0 sm:$0xff]  ;;  %v880_v18 = vld [vmem:[%s379_s12 + $0x1] ss:$0 sm:$0xff] }
  0x46   : > { %915 = vmatpush3.bf16.msra.mxu0 %v1041_v10  ;;  %923 = vmatpush3.bf16.msra.mxu1 %v1042_v11  ;;  %s425_s13 = scalar_lea.vmem %s1533_s0, %s870_s17  ;;  %s1376_s17 = sshll.u32 %s1520_s28, 2  ;;  %v889_v30 = vld [vmem:[%s379_s12 + $0x2] ss:$0 sm:$0xff] }
  0x47   : > { %916 = vmatprep.subr.bf16.mxu0 %v1213_v9  ;;  %924 = vmatprep.subr.bf16.mxu1 %v1213_v9  ;;  %v427_v14 = vld [vmem:[%s425_s13] sm:$0xf]  ;;  %s654_s7 = sadd.s32 %s1195_s23, %s896_s9  ;;  %s1534_s13 = sadd.s32 4294967295, %s1211_s27  }
  0x48   : > { %s1381_s10 = sand.u32 1, %s1534_s13   ;;  %s1383_s0 = sshll.u32 %s654_s7, 6 }
  0x49   : > { %s407_s21 = scalar_lea.vmem [#allocation4], %s1376_s17  ;;  %s414_s24 = scalar_lea.vmem [#allocation6], %s1376_s17 }
  0x4a   : > { %917 = vmatpush3.bf16.msra.mxu0 %v1043_v12  ;;  %925 = vmatpush3.bf16.msra.mxu1 %v1044_v13  ;;  %s658_s29 = sshll.u32 %s407_s21, 4  ;;  %s673_s28 = sshll.u32 %s414_s24, 4  ;;  %s1393_s29 = int_to_ptr.vmem [resolvable:$true] %s658_s29  ;;  %s1401_s28 = int_to_ptr.vmem [resolvable:$true] %s673_s28 }
  0x4b   : > { %930 = vmatprep.subr.bf16.mxu0 %v1213_v9  ;;  %s1391_s9 = scalar_lea.hbm %s1515_s3, %s1383_s0  ;;  %s1399_s1 = scalar_lea.hbm %s1516_s4, %s1383_s0 }
  0x4c   : > { %s1535_s23 = sand.u32 1, %s1179_s19   ;;  %s1047_s2 = scalar_lea.vmem %s1393_s29, 64 }
  0x4d   : > { %919 = vmatmul.mubr.msk.bf16.vlgmr.msra.gmra.mxu0 %vm451_vm1, %v427_v14  ;;  %927 = vmatmul.mubr.msk.bf16.vlgmr.msra.gmra.mxu1 %vm451_vm1, %v427_v14  ;;  %s633_s8 = scalar_lea.sflag [#allocation5], %s1535_s23  ;;  %p1048_p4 = scmp.ne.s32.totalorder %s1393_s29, %s1047_s2 }
  0x4e   : > { %931 = vmatpush3.bf16.msra.mxu0 %v1045_v15  ;;  %934 = vmatprep.mubr.msk.bf16.mxu0 %vm1214_vm0, %v1213_v9  ;;  %s1215_s7 = smov [#allocation4]  }
  0x4f   : > { %932 = vmatprep.subr.bf16.mxu0 %v1213_v9  ;;  %p1049_p5 = pnand %p1048_p4, %p1329_p10  ;;  %s1051_s13 = sshll.u32 %s1215_s7, 4  ;;  %s1052_s13 = int_to_ptr.vmem [resolvable:$false] %s1051_s13 }
  0x50   : > { %s1053_s6 = scalar_lea.vmem %s1052_s13, 128  ;;  %p1054_p7 = scmp.lt.s32.totalorder %s1393_s29, %s1052_s13 }
  0x51   : > { %p1050_p6 = pneg %p1049_p5  ;;  %p1055_p8 = scmp.lt.s32.totalorder %s1053_s6, %s1047_s2 }
  0x52   : > { %933 = vmatpush3.bf16.msra.mxu0 %v1046_v16 }
  0x53   : > { %p1056_p9 = por %p1055_p8, %p1054_p7 }
  0x55   : > { %935 = vmatmul.mubr.msk.bf16.vlgmr.msra.gmra.mxu0 %vm451_vm1, %v427_v14  ;;  %p1057_p11 = pnand %p1056_p9, %p1050_p6 }
 0x10d   : > { %v489_v19 = vpop.f32.mrf.mxu0  ;;  %v557_v21 = vpop.f32.mrf.mxu1 }
 0x10e   : > { %v490_v20 = vadd.f32 %v871_v17, %v489_v19  ;;  %v558_v23 = vadd.f32 %v880_v18, %v557_v21 }
 0x10f   : > { %v920_v22 = vpop.f32.mrf.mxu0  ;;  %v928_v25 = vpop.f32.mrf.mxu1 }
 0x110   : > { %v495_v24 = vpack.c.bf16 %v490_v20, %v490_v20  ;;  %v563_v26 = vpack.c.bf16 %v558_v23, %v558_v23 }
 0x111   : > { %v492_v27 = vpop.f32.mrf.mxu0  ;;  %v560_v28 = vpop.f32.mrf.mxu1 }
 0x112   : > { %497 = vst.msk [vmem:[%s407_s21] sm:$0xf] %vm496_vm2, %v495_v24  ;;  %564 = vst.msk [vmem:[%s414_s24] sm:$0xf] %vm496_vm2, %v563_v26 }
 0x113   : > { %v921_v29 = vpop.f32.mrf.mxu0 }
 0x114   : > { %1060 = shalt.err (!%p1057_p11)
}
 0x115   : > { %s1061_s12 = scalar_lea.hbm %s1391_s9, 64  ;;  %s1065_s23 = scalar_lea.hbm %s1515_s3, 512 }
 0x116   : > { %p1062_p13 = scmp.ne.s32.totalorder %s1391_s9, %s1061_s12  ;;  %p1066_p2 = scmp.lt.s32.totalorder %s1391_s9, %s1515_s3 }
 0x117   : > { %p1067_p3 = scmp.lt.s32.totalorder %s1065_s23, %s1061_s12 }
 0x118   : > { %p1063_p0 = pnand %p1062_p13, %p1329_p10 }
 0x119   : > { %p1068_p4 = por %p1067_p3, %p1066_p2 }
 0x11a   : > { %p1064_p1 = pneg %p1063_p0 }
 0x11c   : > { %p1069_p5 = pnand %p1068_p4, %p1064_p1 }
 0x11e   : > { %1072 = shalt.err (!%p1069_p5)
}
 0x11f   : > { %942 = dma.vmem_to_hbm [thread:$0]  (%p1329_p10), %s1393_s29, 64, %s1391_s9, %s633_s8   ;;  %v929_v31 = vpop.f32.mrf.mxu1 }
 0x120   : > { %s638_s2 = scalar_lea.sflag [#allocation7], %s1381_s10  ;;  %s1073_s6 = scalar_lea.vmem %s1401_s28, 64 }
 0x121   : > { %p1074_p6 = scmp.ne.s32.totalorder %s1401_s28, %s1073_s6  ;;  %s1216_s30 = smov [#allocation6]  }
 0x122   : > { %s1077_s13 = sshll.u32 %s1216_s30, 4  ;;  %s1078_s13 = int_to_ptr.vmem [resolvable:$false] %s1077_s13 }
 0x123   : > { %p1075_p7 = pnand %p1074_p6, %p1329_p10  ;;  %s1079_s12 = scalar_lea.vmem %s1078_s13, 128 }
 0x124   : > { %p1080_p9 = scmp.lt.s32.totalorder %s1401_s28, %s1078_s13  ;;  %p1081_p11 = scmp.lt.s32.totalorder %s1079_s12, %s1073_s6 }
 0x125   : > { %p1076_p8 = pneg %p1075_p7 }
 0x126   : > { %p1082_p13 = por %p1081_p11, %p1080_p9 }
 0x128   : > { %p1083_p0 = pnand %p1082_p13, %p1076_p8 }
 0x12a   : > { %1086 = shalt.err (!%p1083_p0)
}
 0x12b   : > { %s1087_s29 = scalar_lea.hbm %s1399_s1, 64  ;;  %s1091_s21 = scalar_lea.hbm %s1516_s4, 512 }
 0x12c   : > { %p1088_p1 = scmp.ne.s32.totalorder %s1399_s1, %s1087_s29  ;;  %p1092_p4 = scmp.lt.s32.totalorder %s1399_s1, %s1516_s4 }
 0x12d   : > { %p1093_p5 = scmp.lt.s32.totalorder %s1091_s21, %s1087_s29 }
 0x12e   : > { %p1089_p2 = pnand %p1088_p1, %p1329_p10 }
 0x12f   : > { %p1094_p6 = por %p1093_p5, %p1092_p4 }
 0x130   : > { %p1090_p3 = pneg %p1089_p2 }
 0x132   : > { %p1095_p7 = pnand %p1094_p6, %p1090_p3 }
 0x134   : > { %1098 = shalt.err (!%p1095_p7)
}
 0x135   : > { %943 = dma.vmem_to_hbm [thread:$0]  (%p1329_p10), %s1401_s28, 64, %s1399_s1, %s638_s2   ;;  %v624_v32 = vpop.f32.mrf.mxu0 }
 0x136   : > { %s421_s7 = scalar_lea.vmem [#allocation8], %s1376_s17  ;;  %v625_v33 = vadd.f32 %v889_v30, %v624_v32  ;;  %s1455_s12 = scalar_lea.hbm %s1517_s5, %s1383_s0 }
 0x137   : > { %s688_s6 = sshll.u32 %s421_s7, 4  ;;  %v936_v34 = vpop.f32.mrf.mxu0  ;;  %s1217_s1 = smov [#allocation8]   ;;  %s689_s6 = int_to_ptr.vmem [resolvable:$true] %s688_s6 }
 0x138   : > { %v630_v35 = vpack.c.bf16 %v625_v33, %v625_v33  ;;  %s1099_s29 = scalar_lea.vmem %s689_s6, 64  ;;  %s1103_s28 = sshll.u32 %s1217_s1, 4  ;;  %s1104_s28 = int_to_ptr.vmem [resolvable:$false] %s1103_s28 }
 0x139   : > { %v627_v36 = vpop.f32.mrf.mxu0  ;;  %p1100_p8 = scmp.ne.s32.totalorder %s689_s6, %s1099_s29  ;;  %s1105_s17 = scalar_lea.vmem %s1104_s28, 128 }
 0x13a   : > { %631 = vst.msk [vmem:[%s421_s7] sm:$0xf] %vm496_vm2, %v630_v35  ;;  %p1106_p13 = scmp.lt.s32.totalorder %s689_s6, %s1104_s28  ;;  %p1107_p0 = scmp.lt.s32.totalorder %s1105_s17, %s1099_s29 }
 0x13b   : > { %v937_v37 = vpop.f32.mrf.mxu0  ;;  %p1101_p9 = pnand %p1100_p8, %p1329_p10 }
 0x13c   : > { %p1108_p1 = por %p1107_p0, %p1106_p13 }
 0x13d   : > { %p1102_p11 = pneg %p1101_p9 }
 0x13f   : > { %p1109_p2 = pnand %p1108_p1, %p1102_p11 }
 0x141   : > { %1112 = shalt.err (!%p1109_p2)
}
 0x142   : > { %s1113_s0 = scalar_lea.hbm %s1455_s12, 64  ;;  %s1117_s21 = scalar_lea.hbm %s1517_s5, 512 }
 0x143   : > { %p1114_p3 = scmp.ne.s32.totalorder %s1455_s12, %s1113_s0  ;;  %p1118_p6 = scmp.lt.s32.totalorder %s1455_s12, %s1517_s5 }
 0x144   : > { %p1119_p7 = scmp.lt.s32.totalorder %s1117_s21, %s1113_s0 }
 0x145   : > { %p1115_p4 = pnand %p1114_p3, %p1329_p10 }
 0x146   : > { %p1120_p8 = por %p1119_p7, %p1118_p6 }
 0x147   : > { %p1116_p5 = pneg %p1115_p4 }
 0x149   : > { %p1121_p9 = pnand %p1120_p8, %p1116_p5 }
 0x14b   : > { %1124 = shalt.err (!%p1121_p9)
}
 0x14c   : > { %944 = dma.vmem_to_hbm [thread:$0]  (%p1329_p10), %s689_s6, 64, %s1455_s12, %s638_s2  }
 0x14d PF: > { %p958_p11 = scmp.ge.s32.totalorder %s1211_s27, 2  ;;  %s700_s7 = sand.u32 1, %s1175_s18  }
 0x14e   : > { %s701_s30 = scalar_lea.sflag [#allocation5], %s700_s7 }
 0x14f   : > { %p949_p13 = pnand %p958_p11, %p1338_p12 }
 0x151   : > { %p950_p0 = pneg %p949_p13 }
 0x153   : > { %1166 = dma.done.wait (%p950_p0), %s701_s30, 64  }
 0x154   : > { %1168 = vsyncadd (%p950_p0), %s701_s30, 4294967232  ;;  %s1536_s13 = sadd.s32 4294967294, %s1211_s27  }
 0x155   : > { %s709_s29 = sand.u32 1, %s1536_s13  }
 0x156   : > { %s710_s14 = scalar_lea.sflag [#allocation7], %s709_s29 }
 0x157   : > { %1170 = dma.done.wait (%p950_p0), %s710_s14, 128  }
 0x158   : > { %1172 = vsyncadd (%p950_p0), %s710_s14, 4294967168  ;;  %s22_s27 = sadd.s32 1, %s1211_s27   ;;  %s1537_s16 = sld [smem:[#allocation11_spill]] }
 0x159   : > { %p19_p10 = scmp.ge.s32.totalorder %s22_s27, 10   ;;  %s1538_s10 = sld [smem:[#allocation12_spill]] }
 0x15a   : > { %s1539_s18 = smov %s1179_s19  ;;  %s1540_s19 = smov %s1183_s20 }
 0x15b   : > { %s1541_s20 = smov %s1336_s15  ;;  %s1542_s21 = smov %s1191_s22 }
 0x15c   : > { %s1543_s22 = smov %s1321_s11  ;;  %s1544_s23 = smov %s1203_s25 }
 0x15d   : > { %s1545_s24 = smov %s1207_s26  ;;  %21 = sbr.rel (!%p19_p10) target bundleno = 12 (0xc), region = 194 }
 0x15e   : > { %s1546_s25 = smov %s1537_s16 }
 0x15f   : > { %s1547_s26 = smov %s1538_s10 }
 0x162   :  { %724 = vsyncpa [#allocation5], 1 }
 0x163   :  { %726 = vsyncpa [#allocation5 + $0x1], 1 }
 0x164   :  { %727 = vsyncpa [#allocation7], 1 }
 0x165   :  { %729 = vsyncpa [#allocation7 + $0x1], 1 }

</bundles_post_ra>
